<compile_context>
chip_gen: v7x
topology: tpu7x:2x2x1
jax: 0.10.0
libtpu: 0.0.40
codegen_flags: <defaults>
</compile_context>

<pallas_src>
import jax
import jax.numpy as jnp
from jax import lax
from jax.experimental import pallas as pl
from jax.experimental.pallas import tpu as pltpu


# Conservative planning budget for streamed tiles: fits every generation's
# scoped-VMEM once we raise vmem_limit_bytes explicitly (v5e default is 16MiB).
_PLANNING_VMEM_BUDGET = 32 << 20


def _pick_k_tile(f_in, b, hid, budget_bytes):
    """Largest 128-multiple divisor of f_in whose double-buffered streams
    (x_q + x_k in f32, w1 in bf16) use at most ~half the VMEM budget."""
    if f_in % 128 != 0:
        return f_in  # full-dim block (allowed by the (8,128) rule)
    per128 = 2 * (2 * b * 128 * 4 + 128 * hid * 2)  # 2x buffers per 128 of K
    max_mult = max(1, min(64, (budget_bytes // 2) // per128))  # tk <= 8192
    q = f_in // 128
    best = 1
    for m in range(1, int(min(max_mult, q)) + 1):
        if q % m == 0:
            best = m
    return 128 * best


def _vmem_limit_bytes(b, tk, hid, d):
    streamed = 2 * (2 * b * tk * 4 + tk * hid * 2)     # dbl-buffered x_q/x_k + w1
    resident = (hid * 4 + hid * d * 2 + d * 4          # b1, w2, b2
                + 2 * b * 4 * 2                        # labels
                + 2 * b * hid * 4                      # acc_q + acc_k scratch
                + 8 * (2 * b) * (2 * b) * 4)           # loss temporaries headroom
    return int(min(max(2 * (streamed + resident), 16 << 20), 40 << 20))


# ------------------------- fused encoder + loss kernel ----------------------
def _fused_kernel(inv_t_ref, xq_ref, xk_ref, w1_ref, b1_ref, w2_ref, b2_ref,
                  lab_col_ref, lab_row_ref, out_ref, acc_q_ref, acc_k_ref):
    k = pl.program_id(0)

    @pl.when(k == 0)
    def _():
        acc_q_ref[...] = jnp.zeros_like(acc_q_ref)
        acc_k_ref[...] = jnp.zeros_like(acc_k_ref)

    # ---- streamed K-step of the first GEMM.  bf16 cast happens on the VPU
    #      (free under a mem/MXU-bound GEMM); accumulation stays f32.
    w1t = w1_ref[...]                                  # (tk, HID) bf16
    acc_q_ref[...] += jnp.dot(xq_ref[...].astype(jnp.bfloat16), w1t,
                              preferred_element_type=jnp.float32)
    acc_k_ref[...] += jnp.dot(xk_ref[...].astype(jnp.bfloat16), w1t,
                              preferred_element_type=jnp.float32)

    # ---- finalize: ReLU -> w2 -> L2 normalize -> sup-contrastive loss
    @pl.when(k == pl.num_programs(0) - 1)
    def _():
        b1 = b1_ref[...]
        w2 = w2_ref[...]
        b2 = b2_ref[...]
        inv_t = inv_t_ref[0, 0]

        def project(acc):
            h = jnp.maximum(acc + b1, 0.0)
            f = jnp.dot(h.astype(jnp.bfloat16), w2,
                        preferred_element_type=jnp.float32) + b2
            sumsq = jnp.sum(f * f, axis=1, keepdims=True)
            return f * lax.rsqrt(jnp.maximum(sumsq, 1e-24))   # EUP rsqrt

        fnq = project(acc_q_ref[...])                  # (B, D) f32, normalized
        fnk = project(acc_k_ref[...])

        b_rows = fnq.shape[0]
        n = 2 * b_rows

        def sim(a, c):
            return lax.dot_general(a, c, (((1,), (1,)), ((), ())),
                                   preferred_element_type=jnp.float32) * inv_t

        s_qq = sim(fnq, fnq)
        s_qk = sim(fnq, fnk)
        s_kq = sim(fnk, fnq)
        s_kk = sim(fnk, fnk)

        ridx = lax.broadcasted_iota(jnp.int32, (b_rows, b_rows), 0)
        cidx = lax.broadcasted_iota(jnp.int32, (b_rows, b_rows), 1)
        diag = ridx == cidx
        # Labels are tiled, so every quadrant of the repeated mask equals eq.
        eq = (lab_col_ref[...] == lab_row_ref[...]).astype(jnp.float32)

        # NOTE: keep the self-contrast fill FINITE (-1e30).  Using -inf would
        # produce 0*(-inf)=NaN in the masked sums below.  log_prob is
        # row-shift invariant, so this matches the reference's full-row max.
        neg_big = jnp.float32(-1e30)

        def anchor_block(s_self, s_other):
            # s_self: same-view block (its diagonal is the excluded self pair)
            s_self_nd = jnp.where(diag, neg_big, s_self)
            m = jnp.maximum(jnp.max(s_self_nd, axis=1, keepdims=True),
                            jnp.max(s_other, axis=1, keepdims=True))
            denom = (jnp.sum(jnp.exp(s_self_nd - m), axis=1, keepdims=True)
                     + jnp.sum(jnp.exp(s_other - m), axis=1, keepdims=True))
            logd = m + jnp.log(denom)     # log sum_{j != self} exp(s_ij)
            mask_self = jnp.where(diag, 0.0, eq)
            cnt = (jnp.sum(mask_self, axis=1, keepdims=True)
                   + jnp.sum(eq, axis=1, keepdims=True))
            num = (jnp.sum(mask_self * s_self, axis=1, keepdims=True)
                   + jnp.sum(eq * s_other, axis=1, keepdims=True)
                   - cnt * logd)
            return num / cnt              # (B,1) mean_log_prob_pos

        mlpp_q = anchor_block(s_qq, s_qk)
        mlpp_k = anchor_block(s_kk, s_kq)
        # loss = (-mlpp).view(2, B).mean() == mean over all 2B anchor rows
        out_ref[0, 0] = -(jnp.sum(mlpp_q) + jnp.sum(mlpp_k)) / n


def _fused_forward(xq, xk, w1, b1, w2, b2, lab_col, lab_row, inv_t,
                   k_tile=None):
    b, f_in = xq.shape
    hid = w1.shape[1]
    d = w2.shape[1]
    n = 2 * b

    if k_tile is None:
        k_tile = _pick_k_tile(f_in, b, hid, _PLANNING_VMEM_BUDGET)
    if f_in % k_tile != 0:
        raise ValueError(f"k_tile {k_tile} must divide F_IN {f_in}")
    kt = f_in // k_tile

    smem = pltpu.MemorySpace.SMEM
    grid_spec = pltpu.PrefetchScalarGridSpec(
        num_scalar_prefetch=0,
        grid=(kt,),
        in_specs=[
            pl.BlockSpec(memory_space=smem),                    # inv_t (1,1)
            pl.BlockSpec((b, k_tile), lambda k: (0, k)),        # x_q stream
            pl.BlockSpec((b, k_tile), lambda k: (0, k)),        # x_k stream
            pl.BlockSpec((k_tile, hid), lambda k: (k, 0)),      # w1 stream
            pl.BlockSpec((1, hid), lambda k: (0, 0)),           # b1 (resident)
            pl.BlockSpec((hid, d), lambda k: (0, 0)),           # w2 (resident)
            pl.BlockSpec((1, d), lambda k: (0, 0)),             # b2 (resident)
            pl.BlockSpec((b, 1), lambda k: (0, 0)),             # labels col
            pl.BlockSpec((1, b), lambda k: (0, 0)),             # labels row
        ],
        out_specs=pl.BlockSpec(memory_space=smem),              # (1,1) scalar
        scratch_shapes=[pltpu.VMEM((b, hid), jnp.float32),      # acc_q
                        pltpu.VMEM((b, hid), jnp.float32)],     # acc_k
    )

    flops = 2 * n * f_in * hid + 2 * n * hid * d + 2 * n * n * d
    transcendentals = n * n + 3 * n
    bytes_accessed = (n * f_in * 4 + f_in * hid * 2 + hid * d * 2
                      + hid * 4 + d * 4 + 2 * b * 4 * 2 + 8)

    out = pl.pallas_call(
        _fused_kernel,
        out_shape=jax.ShapeDtypeStruct((1, 1), jnp.float32),
        grid_spec=grid_spec,
        compiler_params=pltpu.CompilerParams(
            dimension_semantics=("arbitrary",),     # K is a reduction axis
            vmem_limit_bytes=_vmem_limit_bytes(b, k_tile, hid, d)),
        cost_estimate=pl.CostEstimate(flops=int(flops),
                                      transcendentals=int(transcendentals),
                                      bytes_accessed=int(bytes_accessed)),
    )(inv_t, xq, xk, w1, b1, w2, b2, lab_col, lab_row)
    return out[0, 0]


# --------------------------------- module ----------------------------------
class SupSimCLRNet:
    """JAX/Pallas port of SupSimCLRNet with a synthetic 2-layer MLP encoder.

    Precision contract: matmul operands run in bf16 (f32 accumulation); the
    normalize / softmax / loss math is f32.  Every row must have at least one
    positive (guaranteed by the q/k label tiling) or the loss would NaN.
    """

    def __init__(self, params, batch_size, T=0.07, k_tile=None):
        w1, b1, w2, b2 = params
        # bf16 weight copies stored once: halves HBM->VMEM traffic for the
        # dominant tensor (w1) and hits the MXU's bf16 rate.  Biases stay f32.
        self.w1 = w1.astype(jnp.bfloat16)
        self.w2 = w2.astype(jnp.bfloat16)
        self.b1 = b1.astype(jnp.float32)
        self.b2 = b2.astype(jnp.float32)
        self.batch_size = batch_size
        self.T = T
        self.k_tile = k_tile

    def __call__(self, im_q, im_k, targets):
        if targets.shape[0] != self.batch_size:
            raise ValueError('Num of labels does not match num of features')
        B = im_q.shape[0]
        # NCHW flatten (identical to torch .view); no concat / cast in HBM —
        # the kernel streams the f32 originals and casts to bf16 on the VPU.
        xq = im_q.reshape(B, -1)
        xk = im_k.reshape(B, -1)

        lab = targets.astype(jnp.int32)
        lab_col = lab.reshape(B, 1)
        lab_row = lab.reshape(1, B)
        inv_t = jnp.full((1, 1), 1.0 / self.T, dtype=jnp.float32)

        return _fused_forward(xq, xk, self.w1, self.b1, self.w2, self.b2,
                              lab_col, lab_row, inv_t, k_tile=self.k_tile)


# --------------------------- pure-JAX reference -----------------------------
def _reference(im_q, im_k, targets, params, T):
    w1, b1, w2, b2 = params
    B = im_q.shape[0]
    x = jnp.concatenate([im_q.reshape(B, -1), im_k.reshape(B, -1)], axis=0)
    h = jnp.dot(x.astype(jnp.bfloat16), w1.astype(jnp.bfloat16),
                preferred_element_type=jnp.float32) + b1
    h = jnp.maximum(h, 0.0)
    f = jnp.dot(h.astype(jnp.bfloat16), w2.astype(jnp.bfloat16),
                preferred_element_type=jnp.float32) + b2
    fn = f * lax.rsqrt(jnp.maximum(jnp.sum(f * f, axis=1, keepdims=True), 1e-24))
    sim = fn @ fn.T / T
    logits = sim - jnp.max(sim, axis=1, keepdims=True)
    lab2 = jnp.concatenate([targets, targets])
    mask = (lab2[:, None] == lab2[None, :]).astype(jnp.float32)
    lmask = 1.0 - jnp.eye(2 * B, dtype=jnp.float32)
    mask = mask * lmask
    exp_l = jnp.exp(logits) * lmask
    log_prob = logits - jnp.log(jnp.sum(exp_l, axis=1, keepdims=True))
    mlpp = jnp.sum(mask * log_prob, axis=1) / jnp.sum(mask, axis=1)
    return jnp.mean(-mlpp)


# ----------------------------------- main -----------------------------------
if __name__ == "__main__":
    B, C, H, W = 2, 4, 16, 16          # small NCHW inputs
    HID, D = 128, 32                   # encoder hidden / projection dims
    T = 0.07
    F_IN = C * H * W                   # 1024

    key = jax.random.PRNGKey(0)
    k_q, k_k, k_w1, k_b1, k_w2, k_b2 = jax.random.split(key, 6)

    im_q = jax.random.normal(k_q, (B, C, H, W), dtype=jnp.float32)
    im_k = jax.random.normal(k_k, (B, C, H, W), dtype=jnp.float32)
    targets = jnp.array([0, 1], dtype=jnp.int32)

    w1 = jax.random.normal(k_w1, (F_IN, HID), dtype=jnp.float32) * 0.02
    b1 = jax.random.normal(k_b1, (1, HID), dtype=jnp.float32) * 0.01
    w2 = jax.random.normal(k_w2, (HID, D), dtype=jnp.float32) * 0.02
    b2 = jax.random.normal(k_b2, (1, D), dtype=jnp.float32) * 0.01
    params = (w1, b1, w2, b2)

    # k_tile=256 -> a 4-step grid, exercising the init/accumulate/finalize
    # pipeline even at these tiny shapes (default auto-picks the largest tile).
    model = SupSimCLRNet(params, batch_size=B, T=T, k_tile=256)
    loss = model(im_q, im_k, targets)
    loss = jax.block_until_ready(loss)

    ref = jax.block_until_ready(_reference(im_q, im_k, targets, params, T))
    assert jnp.isfinite(loss), loss
    assert jnp.allclose(loss, ref, rtol=1e-2, atol=1e-2), (loss, ref)

    print("KERNEL_OK")
</pallas_src>

<mosaic_0001>
module attributes {stable_mosaic.version = 11 : i64} {
  func.func @_fused_kernel(%arg0: i32, %arg1: memref<1x1xf32, #tpu.memory_space<smem>>, %arg2: memref<2x256xf32, #tpu.memory_space<vmem>>, %arg3: memref<2x256xf32, #tpu.memory_space<vmem>>, %arg4: memref<256x128xbf16, #tpu.memory_space<vmem>>, %arg5: memref<1x128xf32, #tpu.memory_space<vmem>>, %arg6: memref<128x32xbf16, #tpu.memory_space<vmem>>, %arg7: memref<1x32xf32, #tpu.memory_space<vmem>>, %arg8: memref<2x1xi32, #tpu.memory_space<vmem>>, %arg9: memref<1x2xi32, #tpu.memory_space<vmem>>, %arg10: memref<1x1xf32, #tpu.memory_space<smem>>, %arg11: memref<2x128xf32, #tpu.memory_space<vmem>>, %arg12: memref<2x128xf32, #tpu.memory_space<vmem>>) attributes {dimension_semantics = [#tpu.dimension_semantics<arbitrary>], iteration_bounds = array<i64: 4>, scalar_prefetch = 0 : i64, scratch_operands = 2 : i64, tpu.core_type = #tpu.core_type<tc>, window_params = [{transform_indices = @transform_0, window_bounds = array<i64: 1, 1>}, {transform_indices = @transform_1, window_bounds = array<i64: 2, 256>}, {transform_indices = @transform_2, window_bounds = array<i64: 2, 256>}, {transform_indices = @transform_3, window_bounds = array<i64: 256, 128>}, {pipeline_mode = #tpu.pipeline_mode<synchronous>, transform_indices = @transform_4, window_bounds = array<i64: 1, 128>}, {pipeline_mode = #tpu.pipeline_mode<synchronous>, transform_indices = @transform_5, window_bounds = array<i64: 128, 32>}, {pipeline_mode = #tpu.pipeline_mode<synchronous>, transform_indices = @transform_6, window_bounds = array<i64: 1, 32>}, {pipeline_mode = #tpu.pipeline_mode<synchronous>, transform_indices = @transform_7, window_bounds = array<i64: 2, 1>}, {pipeline_mode = #tpu.pipeline_mode<synchronous>, transform_indices = @transform_8, window_bounds = array<i64: 1, 2>}, {transform_indices = @transform_9, window_bounds = array<i64: 1, 1>}]} {
    %c0_i32 = arith.constant 0 : i32
    %0 = arith.cmpi eq, %arg0, %c0_i32 : i32
    %1 = arith.extui %0 : i1 to i32
    %c0_i32_0 = arith.constant 0 : i32
    %2 = arith.cmpi ne, %1, %c0_i32_0 : i32
    scf.if %2 {
      %cst_16 = arith.constant 0.000000e+00 : f32
      %19 = vector.broadcast %cst_16 : f32 to vector<2x128xf32>
      %c0_17 = arith.constant 0 : index
      %c0_18 = arith.constant 0 : index
      %20 = vector.load %arg11[%c0_17, %c0_18] : memref<2x128xf32, #tpu.memory_space<vmem>>, vector<2x128xf32>
      tpu.vector_store %arg11[%c0_17, %c0_18], %19 {strides = array<i32>} : memref<2x128xf32, #tpu.memory_space<vmem>>, vector<2x128xf32>,
      %cst_19 = arith.constant 0.000000e+00 : f32
      %21 = vector.broadcast %cst_19 : f32 to vector<2x128xf32>
      %c0_20 = arith.constant 0 : index
      %c0_21 = arith.constant 0 : index
      %22 = vector.load %arg12[%c0_20, %c0_21] : memref<2x128xf32, #tpu.memory_space<vmem>>, vector<2x128xf32>
      tpu.vector_store %arg12[%c0_20, %c0_21], %21 {strides = array<i32>} : memref<2x128xf32, #tpu.memory_space<vmem>>, vector<2x128xf32>,
    } else {
    }
    %c0 = arith.constant 0 : index
    %c0_1 = arith.constant 0 : index
    %3 = vector.load %arg4[%c0, %c0_1] : memref<256x128xbf16, #tpu.memory_space<vmem>>, vector<256x128xbf16>
    %c0_2 = arith.constant 0 : index
    %c0_3 = arith.constant 0 : index
    %4 = vector.load %arg11[%c0_2, %c0_3] : memref<2x128xf32, #tpu.memory_space<vmem>>, vector<2x128xf32>
    %c0_4 = arith.constant 0 : index
    %c0_5 = arith.constant 0 : index
    %5 = vector.load %arg2[%c0_4, %c0_5] : memref<2x256xf32, #tpu.memory_space<vmem>>, vector<2x256xf32>
    %6 = arith.truncf %5 : vector<2x256xf32> to vector<2x256xbf16>
    %cst = arith.constant dense<0.000000e+00> : vector<2x128xf32>
    %7 = tpu.matmul %6, %3, %cst {dimension_numbers = #tpu.dot_dimension_numbers<[1], [0], [0], [1], [0, 0, 1, 1], [], []>} : vector<2x256xbf16>, vector<256x128xbf16>, vector<2x128xf32> -> vector<2x128xf32>
    %8 = arith.addf %4, %7 : vector<2x128xf32>
    %c0_6 = arith.constant 0 : index
    %c0_7 = arith.constant 0 : index
    %9 = vector.load %arg11[%c0_6, %c0_7] : memref<2x128xf32, #tpu.memory_space<vmem>>, vector<2x128xf32>
    tpu.vector_store %arg11[%c0_6, %c0_7], %8 {strides = array<i32>} : memref<2x128xf32, #tpu.memory_space<vmem>>, vector<2x128xf32>,
    %c0_8 = arith.constant 0 : index
    %c0_9 = arith.constant 0 : index
    %10 = vector.load %arg12[%c0_8, %c0_9] : memref<2x128xf32, #tpu.memory_space<vmem>>, vector<2x128xf32>
    %c0_10 = arith.constant 0 : index
    %c0_11 = arith.constant 0 : index
    %11 = vector.load %arg3[%c0_10, %c0_11] : memref<2x256xf32, #tpu.memory_space<vmem>>, vector<2x256xf32>
    %12 = arith.truncf %11 : vector<2x256xf32> to vector<2x256xbf16>
    %cst_12 = arith.constant dense<0.000000e+00> : vector<2x128xf32>
    %13 = tpu.matmul %12, %3, %cst_12 {dimension_numbers = #tpu.dot_dimension_numbers<[1], [0], [0], [1], [0, 0, 1, 1], [], []>} : vector<2x256xbf16>, vector<256x128xbf16>, vector<2x128xf32> -> vector<2x128xf32>
    %14 = arith.addf %10, %13 : vector<2x128xf32>
    %c0_13 = arith.constant 0 : index
    %c0_14 = arith.constant 0 : index
    %15 = vector.load %arg12[%c0_13, %c0_14] : memref<2x128xf32, #tpu.memory_space<vmem>>, vector<2x128xf32>
    tpu.vector_store %arg12[%c0_13, %c0_14], %14 {strides = array<i32>} : memref<2x128xf32, #tpu.memory_space<vmem>>, vector<2x128xf32>,
    %c3_i32 = arith.constant 3 : i32
    %16 = arith.cmpi eq, %arg0, %c3_i32 : i32
    %17 = arith.extui %16 : i1 to i32
    %c0_i32_15 = arith.constant 0 : i32
    %18 = arith.cmpi ne, %17, %c0_i32_15 : i32
    scf.if %18 {
      %c0_16 = arith.constant 0 : index
      %c0_17 = arith.constant 0 : index
      %19 = vector.load %arg5[%c0_16, %c0_17] : memref<1x128xf32, #tpu.memory_space<vmem>>, vector<1x128xf32>
      %c0_18 = arith.constant 0 : index
      %c0_19 = arith.constant 0 : index
      %20 = vector.load %arg6[%c0_18, %c0_19] : memref<128x32xbf16, #tpu.memory_space<vmem>>, vector<128x32xbf16>
      %c0_20 = arith.constant 0 : index
      %c0_21 = arith.constant 0 : index
      %21 = vector.load %arg7[%c0_20, %c0_21] : memref<1x32xf32, #tpu.memory_space<vmem>>, vector<1x32xf32>
      %c0_22 = arith.constant 0 : index
      %c0_23 = arith.constant 0 : index
      %22 = memref.load %arg1[%c0_22, %c0_23] : memref<1x1xf32, #tpu.memory_space<smem>>
      %c0_24 = arith.constant 0 : index
      %c0_25 = arith.constant 0 : index
      %23 = vector.load %arg11[%c0_24, %c0_25] : memref<2x128xf32, #tpu.memory_space<vmem>>, vector<2x128xf32>
      %24 = vector.broadcast %19 : vector<1x128xf32> to vector<2x128xf32>
      %25 = arith.addf %23, %24 : vector<2x128xf32>
      %cst_26 = arith.constant 0.000000e+00 : f32
      %26 = vector.broadcast %cst_26 : f32 to vector<2x128xf32>
      %27 = arith.maximumf %25, %26 : vector<2x128xf32>
      %28 = arith.truncf %27 : vector<2x128xf32> to vector<2x128xbf16>
      %cst_27 = arith.constant dense<0.000000e+00> : vector<2x32xf32>
      %29 = tpu.matmul %28, %20, %cst_27 {dimension_numbers = #tpu.dot_dimension_numbers<[1], [0], [0], [1], [0, 0, 1, 1], [], []>} : vector<2x128xbf16>, vector<128x32xbf16>, vector<2x32xf32> -> vector<2x32xf32>
      %30 = vector.broadcast %21 : vector<1x32xf32> to vector<2x32xf32>
      %31 = arith.addf %29, %30 : vector<2x32xf32>
      %32 = arith.mulf %31, %31 : vector<2x32xf32>
      %cst_28 = arith.constant dense<0.000000e+00> : vector<2xf32>
      %33 = vector.multi_reduction <add>, %32, %cst_28 [1] : vector<2x32xf32> to vector<2xf32>
      %34 = vector.shape_cast %33 : vector<2xf32> to vector<2x1xf32>
      %cst_29 = arith.constant 1.000000e-24 : f32
      %35 = vector.broadcast %cst_29 : f32 to vector<2x1xf32>
      %36 = arith.maximumf %34, %35 : vector<2x1xf32>
      %37 = math.rsqrt %36 : vector<2x1xf32>
      %38 = vector.broadcast %37 : vector<2x1xf32> to vector<2x32xf32>
      %39 = arith.mulf %31, %38 : vector<2x32xf32>
      %c0_30 = arith.constant 0 : index
      %c0_31 = arith.constant 0 : index
      %40 = vector.load %arg12[%c0_30, %c0_31] : memref<2x128xf32, #tpu.memory_space<vmem>>, vector<2x128xf32>
      %41 = vector.broadcast %19 : vector<1x128xf32> to vector<2x128xf32>
      %42 = arith.addf %40, %41 : vector<2x128xf32>
      %cst_32 = arith.constant 0.000000e+00 : f32
      %43 = vector.broadcast %cst_32 : f32 to vector<2x128xf32>
      %44 = arith.maximumf %42, %43 : vector<2x128xf32>
      %45 = arith.truncf %44 : vector<2x128xf32> to vector<2x128xbf16>
      %cst_33 = arith.constant dense<0.000000e+00> : vector<2x32xf32>
      %46 = tpu.matmul %45, %20, %cst_33 {dimension_numbers = #tpu.dot_dimension_numbers<[1], [0], [0], [1], [0, 0, 1, 1], [], []>} : vector<2x128xbf16>, vector<128x32xbf16>, vector<2x32xf32> -> vector<2x32xf32>
      %47 = vector.broadcast %21 : vector<1x32xf32> to vector<2x32xf32>
      %48 = arith.addf %46, %47 : vector<2x32xf32>
      %49 = arith.mulf %48, %48 : vector<2x32xf32>
      %cst_34 = arith.constant dense<0.000000e+00> : vector<2xf32>
      %50 = vector.multi_reduction <add>, %49, %cst_34 [1] : vector<2x32xf32> to vector<2xf32>
      %51 = vector.shape_cast %50 : vector<2xf32> to vector<2x1xf32>
      %cst_35 = arith.constant 1.000000e-24 : f32
      %52 = vector.broadcast %cst_35 : f32 to vector<2x1xf32>
      %53 = arith.maximumf %51, %52 : vector<2x1xf32>
      %54 = math.rsqrt %53 : vector<2x1xf32>
      %55 = vector.broadcast %54 : vector<2x1xf32> to vector<2x32xf32>
      %56 = arith.mulf %48, %55 : vector<2x32xf32>
      %cst_36 = arith.constant dense<0.000000e+00> : vector<2x2xf32>
      %57 = tpu.matmul %39, %39, %cst_36 {dimension_numbers = #tpu.dot_dimension_numbers<[1], [1], [0], [0], [0, 0, 1, 0], [], []>} : vector<2x32xf32>, vector<2x32xf32>, vector<2x2xf32> -> vector<2x2xf32>
      %58 = vector.broadcast %22 : f32 to vector<2x2xf32>
      %59 = arith.mulf %57, %58 : vector<2x2xf32>
      %cst_37 = arith.constant dense<0.000000e+00> : vector<2x2xf32>
      %60 = tpu.matmul %39, %56, %cst_37 {dimension_numbers = #tpu.dot_dimension_numbers<[1], [1], [0], [0], [0, 0, 1, 0], [], []>} : vector<2x32xf32>, vector<2x32xf32>, vector<2x2xf32> -> vector<2x2xf32>
      %61 = vector.broadcast %22 : f32 to vector<2x2xf32>
      %62 = arith.mulf %60, %61 : vector<2x2xf32>
      %cst_38 = arith.constant dense<0.000000e+00> : vector<2x2xf32>
      %63 = tpu.matmul %56, %39, %cst_38 {dimension_numbers = #tpu.dot_dimension_numbers<[1], [1], [0], [0], [0, 0, 1, 0], [], []>} : vector<2x32xf32>, vector<2x32xf32>, vector<2x2xf32> -> vector<2x2xf32>
      %64 = vector.broadcast %22 : f32 to vector<2x2xf32>
      %65 = arith.mulf %63, %64 : vector<2x2xf32>
      %cst_39 = arith.constant dense<0.000000e+00> : vector<2x2xf32>
      %66 = tpu.matmul %56, %56, %cst_39 {dimension_numbers = #tpu.dot_dimension_numbers<[1], [1], [0], [0], [0, 0, 1, 0], [], []>} : vector<2x32xf32>, vector<2x32xf32>, vector<2x2xf32> -> vector<2x2xf32>
      %67 = vector.broadcast %22 : f32 to vector<2x2xf32>
      %68 = arith.mulf %66, %67 : vector<2x2xf32>
      %69 = tpu.iota {dimensions = array<i32: 0>} : vector<2x2xi32>
      %70 = tpu.iota {dimensions = array<i32: 1>} : vector<2x2xi32>
      %71 = arith.cmpi eq, %69, %70 : vector<2x2xi32>
      %c0_40 = arith.constant 0 : index
      %c0_41 = arith.constant 0 : index
      %72 = vector.load %arg8[%c0_40, %c0_41] : memref<2x1xi32, #tpu.memory_space<vmem>>, vector<2x1xi32>
      %c0_42 = arith.constant 0 : index
      %c0_43 = arith.constant 0 : index
      %73 = vector.load %arg9[%c0_42, %c0_43] : memref<1x2xi32, #tpu.memory_space<vmem>>, vector<1x2xi32>
      %74 = vector.broadcast %72 : vector<2x1xi32> to vector<2x2xi32>
      %75 = vector.broadcast %73 : vector<1x2xi32> to vector<2x2xi32>
      %76 = arith.cmpi eq, %74, %75 : vector<2x2xi32>
      %77 = arith.extui %76 : vector<2x2xi1> to vector<2x2xi32>
      %78 = arith.sitofp %77 : vector<2x2xi32> to vector<2x2xf32>
      %cst_44 = arith.constant -1.000000e+30 : f32
      %79 = vector.broadcast %cst_44 : f32 to vector<2x2xf32>
      %80 = arith.select %71, %79, %59 : vector<2x2xi1>, vector<2x2xf32>
      %cst_45 = arith.constant dense<0xFF800000> : vector<2xf32>
      %81 = vector.multi_reduction <maximumf>, %80, %cst_45 [1] : vector<2x2xf32> to vector<2xf32>
      %82 = vector.shape_cast %81 : vector<2xf32> to vector<2x1xf32>
      %cst_46 = arith.constant dense<0xFF800000> : vector<2xf32>
      %83 = vector.multi_reduction <maximumf>, %62, %cst_46 [1] : vector<2x2xf32> to vector<2xf32>
      %84 = vector.shape_cast %83 : vector<2xf32> to vector<2x1xf32>
      %85 = arith.maximumf %82, %84 : vector<2x1xf32>
      %86 = vector.broadcast %85 : vector<2x1xf32> to vector<2x2xf32>
      %87 = arith.subf %80, %86 : vector<2x2xf32>
      %88 = math.exp %87 : vector<2x2xf32>
      %cst_47 = arith.constant dense<0.000000e+00> : vector<2xf32>
      %89 = vector.multi_reduction <add>, %88, %cst_47 [1] : vector<2x2xf32> to vector<2xf32>
      %90 = vector.shape_cast %89 : vector<2xf32> to vector<2x1xf32>
      %91 = vector.broadcast %85 : vector<2x1xf32> to vector<2x2xf32>
      %92 = arith.subf %62, %91 : vector<2x2xf32>
      %93 = math.exp %92 : vector<2x2xf32>
      %cst_48 = arith.constant dense<0.000000e+00> : vector<2xf32>
      %94 = vector.multi_reduction <add>, %93, %cst_48 [1] : vector<2x2xf32> to vector<2xf32>
      %95 = vector.shape_cast %94 : vector<2xf32> to vector<2x1xf32>
      %96 = arith.addf %90, %95 : vector<2x1xf32>
      %97 = math.log %96 : vector<2x1xf32>
      %98 = arith.addf %85, %97 : vector<2x1xf32>
      %cst_49 = arith.constant 0.000000e+00 : f32
      %99 = vector.broadcast %cst_49 : f32 to vector<2x2xf32>
      %100 = arith.select %71, %99, %78 : vector<2x2xi1>, vector<2x2xf32>
      %cst_50 = arith.constant dense<0.000000e+00> : vector<2xf32>
      %101 = vector.multi_reduction <add>, %100, %cst_50 [1] : vector<2x2xf32> to vector<2xf32>
      %102 = vector.shape_cast %101 : vector<2xf32> to vector<2x1xf32>
      %cst_51 = arith.constant dense<0.000000e+00> : vector<2xf32>
      %103 = vector.multi_reduction <add>, %78, %cst_51 [1] : vector<2x2xf32> to vector<2xf32>
      %104 = vector.shape_cast %103 : vector<2xf32> to vector<2x1xf32>
      %105 = arith.addf %102, %104 : vector<2x1xf32>
      %106 = arith.mulf %100, %59 : vector<2x2xf32>
      %cst_52 = arith.constant dense<0.000000e+00> : vector<2xf32>
      %107 = vector.multi_reduction <add>, %106, %cst_52 [1] : vector<2x2xf32> to vector<2xf32>
      %108 = vector.shape_cast %107 : vector<2xf32> to vector<2x1xf32>
      %109 = arith.mulf %78, %62 : vector<2x2xf32>
      %cst_53 = arith.constant dense<0.000000e+00> : vector<2xf32>
      %110 = vector.multi_reduction <add>, %109, %cst_53 [1] : vector<2x2xf32> to vector<2xf32>
      %111 = vector.shape_cast %110 : vector<2xf32> to vector<2x1xf32>
      %112 = arith.addf %108, %111 : vector<2x1xf32>
      %113 = arith.mulf %105, %98 : vector<2x1xf32>
      %114 = arith.subf %112, %113 : vector<2x1xf32>
      %115 = arith.divf %114, %105 : vector<2x1xf32>
      %cst_54 = arith.constant -1.000000e+30 : f32
      %116 = vector.broadcast %cst_54 : f32 to vector<2x2xf32>
      %117 = arith.select %71, %116, %68 : vector<2x2xi1>, vector<2x2xf32>
      %cst_55 = arith.constant dense<0xFF800000> : vector<2xf32>
      %118 = vector.multi_reduction <maximumf>, %117, %cst_55 [1] : vector<2x2xf32> to vector<2xf32>
      %119 = vector.shape_cast %118 : vector<2xf32> to vector<2x1xf32>
      %cst_56 = arith.constant dense<0xFF800000> : vector<2xf32>
      %120 = vector.multi_reduction <maximumf>, %65, %cst_56 [1] : vector<2x2xf32> to vector<2xf32>
      %121 = vector.shape_cast %120 : vector<2xf32> to vector<2x1xf32>
      %122 = arith.maximumf %119, %121 : vector<2x1xf32>
      %123 = vector.broadcast %122 : vector<2x1xf32> to vector<2x2xf32>
      %124 = arith.subf %117, %123 : vector<2x2xf32>
      %125 = math.exp %124 : vector<2x2xf32>
      %cst_57 = arith.constant dense<0.000000e+00> : vector<2xf32>
      %126 = vector.multi_reduction <add>, %125, %cst_57 [1] : vector<2x2xf32> to vector<2xf32>
      %127 = vector.shape_cast %126 : vector<2xf32> to vector<2x1xf32>
      %128 = vector.broadcast %122 : vector<2x1xf32> to vector<2x2xf32>
      %129 = arith.subf %65, %128 : vector<2x2xf32>
      %130 = math.exp %129 : vector<2x2xf32>
      %cst_58 = arith.constant dense<0.000000e+00> : vector<2xf32>
      %131 = vector.multi_reduction <add>, %130, %cst_58 [1] : vector<2x2xf32> to vector<2xf32>
      %132 = vector.shape_cast %131 : vector<2xf32> to vector<2x1xf32>
      %133 = arith.addf %127, %132 : vector<2x1xf32>
      %134 = math.log %133 : vector<2x1xf32>
      %135 = arith.addf %122, %134 : vector<2x1xf32>
      %cst_59 = arith.constant 0.000000e+00 : f32
      %136 = vector.broadcast %cst_59 : f32 to vector<2x2xf32>
      %137 = arith.select %71, %136, %78 : vector<2x2xi1>, vector<2x2xf32>
      %cst_60 = arith.constant dense<0.000000e+00> : vector<2xf32>
      %138 = vector.multi_reduction <add>, %137, %cst_60 [1] : vector<2x2xf32> to vector<2xf32>
      %139 = vector.shape_cast %138 : vector<2xf32> to vector<2x1xf32>
      %cst_61 = arith.constant dense<0.000000e+00> : vector<2xf32>
      %140 = vector.multi_reduction <add>, %78, %cst_61 [1] : vector<2x2xf32> to vector<2xf32>
      %141 = vector.shape_cast %140 : vector<2xf32> to vector<2x1xf32>
      %142 = arith.addf %139, %141 : vector<2x1xf32>
      %143 = arith.mulf %137, %68 : vector<2x2xf32>
      %cst_62 = arith.constant dense<0.000000e+00> : vector<2xf32>
      %144 = vector.multi_reduction <add>, %143, %cst_62 [1] : vector<2x2xf32> to vector<2xf32>
      %145 = vector.shape_cast %144 : vector<2xf32> to vector<2x1xf32>
      %146 = arith.mulf %78, %65 : vector<2x2xf32>
      %cst_63 = arith.constant dense<0.000000e+00> : vector<2xf32>
      %147 = vector.multi_reduction <add>, %146, %cst_63 [1] : vector<2x2xf32> to vector<2xf32>
      %148 = vector.shape_cast %147 : vector<2xf32> to vector<2x1xf32>
      %149 = arith.addf %145, %148 : vector<2x1xf32>
      %150 = arith.mulf %142, %135 : vector<2x1xf32>
      %151 = arith.subf %149, %150 : vector<2x1xf32>
      %152 = arith.divf %151, %142 : vector<2x1xf32>
      %153 = vector.shape_cast %115 : vector<2x1xf32> to vector<1x2x1xf32>
      %cst_64 = arith.constant dense<0.000000e+00> : vector<1xf32>
      %154 = vector.multi_reduction <add>, %153, %cst_64 [1, 2] : vector<1x2x1xf32> to vector<1xf32>
      %155 = vector.shape_cast %154 : vector<1xf32> to vector<1x1x1xf32>
      %156 = vector.extract %155[0, 0, 0] : f32 from vector<1x1x1xf32>
      %157 = vector.shape_cast %152 : vector<2x1xf32> to vector<1x2x1xf32>
      %cst_65 = arith.constant dense<0.000000e+00> : vector<1xf32>
      %158 = vector.multi_reduction <add>, %157, %cst_65 [1, 2] : vector<1x2x1xf32> to vector<1xf32>
      %159 = vector.shape_cast %158 : vector<1xf32> to vector<1x1x1xf32>
      %160 = vector.extract %159[0, 0, 0] : f32 from vector<1x1x1xf32>
      %161 = arith.addf %156, %160 : f32
      %cst_66 = arith.constant 0.000000e+00 : f32
      %162 = arith.subf %cst_66, %161 : f32
      %cst_67 = arith.constant 4.000000e+00 : f32
      %163 = arith.divf %162, %cst_67 : f32
      %c0_68 = arith.constant 0 : index
      %c0_69 = arith.constant 0 : index
      %164 = memref.load %arg10[%c0_68, %c0_69] : memref<1x1xf32, #tpu.memory_space<smem>>
      memref.store %163, %arg10[%c0_68, %c0_69] : memref<1x1xf32, #tpu.memory_space<smem>>
    } else {
    }
    return
  }
  func.func @transform_0(%arg0: i32) -> (i32, i32) {
    %c0_i32 = arith.constant 0 : i32
    %c0_i32_0 = arith.constant 0 : i32
    %c0_i32_1 = arith.constant 0 : i32
    return %c0_i32, %c0_i32_0 : i32, i32
  }
  func.func @transform_1(%arg0: i32) -> (i32, i32) {
    %c0_i32 = arith.constant 0 : i32
    %c0_i32_0 = arith.constant 0 : i32
    return %c0_i32, %arg0 : i32, i32
  }
  func.func @transform_2(%arg0: i32) -> (i32, i32) {
    %c0_i32 = arith.constant 0 : i32
    %c0_i32_0 = arith.constant 0 : i32
    return %c0_i32, %arg0 : i32, i32
  }
  func.func @transform_3(%arg0: i32) -> (i32, i32) {
    %c0_i32 = arith.constant 0 : i32
    %c0_i32_0 = arith.constant 0 : i32
    return %arg0, %c0_i32 : i32, i32
  }
  func.func @transform_4(%arg0: i32) -> (i32, i32) {
    %c0_i32 = arith.constant 0 : i32
    %c0_i32_0 = arith.constant 0 : i32
    %c0_i32_1 = arith.constant 0 : i32
    return %c0_i32, %c0_i32_0 : i32, i32
  }
  func.func @transform_5(%arg0: i32) -> (i32, i32) {
    %c0_i32 = arith.constant 0 : i32
    %c0_i32_0 = arith.constant 0 : i32
    %c0_i32_1 = arith.constant 0 : i32
    return %c0_i32, %c0_i32_0 : i32, i32
  }
  func.func @transform_6(%arg0: i32) -> (i32, i32) {
    %c0_i32 = arith.constant 0 : i32
    %c0_i32_0 = arith.constant 0 : i32
    %c0_i32_1 = arith.constant 0 : i32
    return %c0_i32, %c0_i32_0 : i32, i32
  }
  func.func @transform_7(%arg0: i32) -> (i32, i32) {
    %c0_i32 = arith.constant 0 : i32
    %c0_i32_0 = arith.constant 0 : i32
    %c0_i32_1 = arith.constant 0 : i32
    return %c0_i32, %c0_i32_0 : i32, i32
  }
  func.func @transform_8(%arg0: i32) -> (i32, i32) {
    %c0_i32 = arith.constant 0 : i32
    %c0_i32_0 = arith.constant 0 : i32
    %c0_i32_1 = arith.constant 0 : i32
    return %c0_i32, %c0_i32_0 : i32, i32
  }
  func.func @transform_9(%arg0: i32) -> (i32, i32) {
    %c0_i32 = arith.constant 0 : i32
    %c0_i32_0 = arith.constant 0 : i32
    %c0_i32_1 = arith.constant 0 : i32
    return %c0_i32, %c0_i32_0 : i32, i32
  }
}

</mosaic_0001>

<bundles_post_ra>
// kernel: tpu_custom_call.1
= control target key start
LH: loop header
LB: loop body
LE: loop exit
PB: predicated region body
PF: predicated region fallthrough
CT: control target
= control target key end

     0   :  { %s1998_s0 = inlined_call_operand.<no memory space> [shape: f32[1,1], index: 0, kind: input, shape index: {}]   ;;  %s1999_s1 = inlined_call_operand.vmem [shape: f32[2,1024], index: 1, kind: input, shape index: {}]   ;;  %s2000_s2 = inlined_call_operand.vmem [shape: f32[2,1024], index: 2, kind: input, shape index: {}]   ;;  %s2001_s3 = inlined_call_operand.hbm [shape: bf16[1024,128], index: 3, kind: input, shape index: {}]   ;;  %s2002_s4 = inlined_call_operand.vmem [shape: f32[1,128], index: 4, kind: input, shape index: {}]   ;;  %s2003_s5 = inlined_call_operand.vmem [shape: bf16[128,32], index: 5, kind: input, shape index: {}]   ;;  %s2004_s6 = inlined_call_operand.vmem [shape: f32[1,32], index: 6, kind: input, shape index: {}]   ;;  %s2005_s7 = inlined_call_operand.vmem [shape: s32[2,1], index: 7, kind: input, shape index: {}]   ;;  %s2006_s8 = inlined_call_operand.vmem [shape: s32[1,2], index: 8, kind: input, shape index: {}]   ;;  %s2007_s9 = inlined_call_operand.hbm [shape: f32[1,1], index: 9, kind: output, shape index: {}]  }
   0x1   :  { %14 = sst [smem:[#allocation4]] %s1998_s0 }
   0x2   :  { %15 = vsyncpa [#allocation6], 0 }
   0x3   :  { %17 = vsyncpa [#allocation6 + $0x1], 0 }
   0x4   :  { %18 = vsyncpa [#allocation7], 0  ;;  %s1748_s11 = smov 0   ;;  %s1750_s12 = smov 0  }
   0x5   :  { %s1752_s13 = smov 0   ;;  %s1754_s14 = smov 0  }
   0x6 LB: > { %s1767_s0 = sadd.s32 4294967295, %s1685_s14   ;;  %s1770_s15 = sadd.s32 1, %s1685_s14   ;;  %s1685_s14 = sphi %s1754_s14, %s2014_s14   ;;  %s1681_s13 = sphi %s1752_s13, %s2013_s13   ;;  %s1677_s12 = sphi %s1750_s12, %s2012_s12   ;;  %s1673_s11 = sphi %s1748_s11, %s2011_s11  }
   0x7   : > { %s101_s16 = ssub.s32 %s1685_s14, %s1770_s15  ;;  %s104_s17 = sadd.s32 1, %s1681_s13 }
   0x8   : > { %p102_p0 = scmp.eq.s32.totalorder %s101_s16, 0  ;;  %p111_p1 = scmp.ne.s32.totalorder %s1681_s13, %s1677_s12 }
   0x9   : > { %p112_p2 = scmp.eq.s32.totalorder %s1685_s14, 0  ;;  %p117_p3 = scmp.ne.s32.totalorder %s1677_s12, %s1673_s11 }
   0xa   : > { %s1780_s18 = scalar_select %p102_p0, %s1681_s13, %s104_s17  }
   0xb   : > { %p113_p4 = por %p112_p2, %p111_p1  ;;  %p118_p5 = scmp.eq.s32.totalorder %s1767_s0, 0 }
   0xc   : > { %p1520_p6 = scmp.lt.s32.totalorder %s1685_s14, 4  ;;  %s303_s20 = sand.u32 1, %s1681_s13  }
   0xd   : > { %p1784_p7 = por %p118_p5, %p117_p3  ;;  %s1322_s21 = sshll.u32 %s303_s20, 7 }
   0xe   : > { %s1375_s22 = sshll.u32 %s1685_s14, 11  ;;  %s307_s26 = scalar_lea.vmem [#allocation5], %s1322_s21 }
   0xf   : > { %s1793_s25 = scalar_lea.hbm %s2001_s3, %s1375_s22  ;;  %s314_s27 = sshll.u32 %s307_s26, 4  ;;  %s1795_s27 = int_to_ptr.vmem [resolvable:$true] %s314_s27 }
  0x10   : > { %p1797_p8 = pnand %p1520_p6, %p113_p4  ;;  %s1802_s29 = scalar_lea.sflag [#allocation6], %s303_s20 }
  0x11   : > { %s1605_s30 = scalar_lea.hbm %s1793_s25, 2048  ;;  %s1610_s16 = scalar_lea.hbm %s2001_s3, 8192 }
  0x12   : > { %p1606_p10 = scmp.ne.s32.totalorder %s1793_s25, %s1605_s30  ;;  %p1607_p11 = pneg %p1797_p8 }
  0x13   : > { %p1611_p0 = scmp.lt.u32.totalorder %s1793_s25, %s2001_s3  ;;  %p1612_p1 = scmp.lt.u32.totalorder %s1610_s16, %s1605_s30 }
  0x14   : > { %p1608_p12 = pnand %p1607_p11, %p1606_p10  ;;  %p1614_p3 = scmp.lt.u32.totalorder %s1605_s30, %s1793_s25 }
  0x15   : > { %p1613_p2 = por %p1612_p1, %p1611_p0 }
  0x16   : > { %p1609_p13 = pneg %p1608_p12 }
  0x17   : > { %p1615_p4 = por %p1614_p3, %p1613_p2 }
  0x19   : > { %p1616_p5 = pnand %p1615_p4, %p1609_p13 }
  0x1b   : > { %1619 = shalt.err (!%p1616_p5)
}
  0x1c   : > { %s1620_s20 = scalar_lea.vmem %s1795_s27, 2048  ;;  %s1687_s22 = smov [#allocation5]  }
  0x1d   : > { %p1621_p6 = scmp.ne.s32.totalorder %s1795_s27, %s1620_s20  ;;  %s1625_s23 = sshll.u32 %s1687_s22, 4  ;;  %s1626_s23 = int_to_ptr.vmem [resolvable:$false] %s1625_s23 }
  0x1e   : > { %s1627_s24 = scalar_lea.vmem %s1626_s23, 4096  ;;  %p1628_p9 = scmp.lt.s32.totalorder %s1795_s27, %s1626_s23 }
  0x1f   : > { %p1623_p10 = pnand %p1621_p6, %p1607_p11  ;;  %p1629_p0 = scmp.lt.s32.totalorder %s1627_s24, %s1620_s20 }
  0x21   : > { %p1624_p12 = pneg %p1623_p10  ;;  %p1630_p1 = por %p1629_p0, %p1628_p9 }
  0x23   : > { %p1631_p2 = pnand %p1630_p1, %p1624_p12 }
  0x25   : > { %1634 = shalt.err (!%p1631_p2)
}
  0x26   : > { %s1688_s26 = smov 64   ;;  %s1689_s30 = smov 4  }
  0x27   : > { %1519 = dma.hbm_to_vmem [thread:$0]  (!%p1797_p8), %s1793_s25, 2048, %s1795_s27, %s1802_s29, %s1688_s26, %s1688_s26, %s1689_s30  }
  0x28   : > { %p322_p11 = scmp.lt.s32.totalorder %s1685_s14, 5  ;;  %p2010_p13 = scmp.ge.s32.totalorder %s1685_s14, 1 }
  0x2a   : > { %p323_p3 = pnand %p2010_p13, %p322_p11 }
  0x2b   : > { %s328_s10 = sand.u32 (!%p323_p3), 1, %s1677_s12  }
  0x2c   : > { %326 = sbr.rel (%p323_p3) target bundleno = 1489 (0x5d1), region = 56  ;;  %s1326_s11 = sshll.u32 (!%p323_p3), %s328_s10, 7 }
  0x2d   : > { %s329_s16 = scalar_lea.sflag (!%p323_p3), [#allocation6], %s328_s10  ;;  %s1834_s17 = scalar_lea.vmem (!%p323_p3), [#allocation5], %s1326_s11 }
  0x33   : > { %1664 = dma.done.wait (%p1784_p7), %s329_s16, 2048  }
  0x34   : > { %1666 = vsyncadd (%p1784_p7), %s329_s16, 4294965248  ;;  %s1327_s21 = sshll.u32 %s1767_s0, 1  ;;  %p1331_p8 = scmp.ne.s32.totalorder %s1767_s0, 0 }
  0x35   : > { %p373_p9 = scmp.lt.s32.totalorder %s1327_s21, 7  ;;  %v1690_v0 = vmov (!%p1331_p8), 0.0  }
  0x36   : > { %389 = sbr.rel (%p1331_p8) target bundleno = 61 (0x3d), region = 64  ;;  %390 = vst [vmem:[#allocation2] sm:$0x3] (!%p1331_p8), %v1690_v0  ;;  %391 = vst [vmem:[#allocation3] sm:$0x3] (!%p1331_p8), %v1690_v0 }
  0x37   : > { %s2016_s21 = smov (!%p373_p9, %s1327_s21), 7 }
  0x38   : > { %s1328_s25 = sshll.u32 %s2016_s21, 1 }
  0x39   : > { %s1844_s28 = scalar_lea.vmem %s1999_s1, %s1328_s25  ;;  %s1849_s22 = scalar_lea.vmem %s2000_s2, %s1328_s25 }
  0x3d PF: > { %v1562_v1 = vld [vmem:[%s1834_s17 + $0x40] sm:$0xff]   ;;  %v1564_v3 = vld [vmem:[%s1834_s17 + $0x48] sm:$0xff]   ;;  %v1566_v5 = vld [vmem:[%s1834_s17 + $0x50] sm:$0xff]   ;;  %p1350_p7 = scmp.ne.s32.totalorder %s1767_s0, 3 }
  0x3e   : > { %v1563_v2 = vld [vmem:[%s1834_s17] sm:$0xff]   ;;  %1376 = vmatprep.subr.bf16.mxu0 %v1562_v1  ;;  %1398 = vmatprep.subr.bf16.mxu1 %v1562_v1  ;;  %v1565_v4 = vld [vmem:[%s1834_s17 + $0x8] sm:$0xff]   ;;  %v1567_v6 = vld [vmem:[%s1834_s17 + $0x10] sm:$0xff]   ;;  %v1691_v40 = vmov (!%p1350_p7), 0.0   ;;  %vm1692_vm0 = vmmov (!%p1350_p7), 0   ;;  %vm762_vm1 = vcmask (!%p1350_p7), 254976  }
  0x3f   : > { %1377 = vmatpush3.bf16.msra.mxu0 %v1563_v2  ;;  %1399 = vmatpush3.bf16.msra.mxu1 %v1563_v2  ;;  %v1568_v7 = vld [vmem:[%s1834_s17 + $0x58] sm:$0xff]   ;;  %v1570_v9 = vld [vmem:[%s1834_s17 + $0x60] sm:$0xff]   ;;  %v1572_v11 = vld [vmem:[%s1834_s17 + $0x68] sm:$0xff]   ;;  %vm820_vm2 = vcmask (!%p1350_p7), 261120   ;;  %s656_s26 = sld [smem:[#allocation4]] (!%p1350_p7)  ;;  %vm1130_vm3 = vcmask (!%p1350_p7), 9216  }
  0x40   : > { %1378 = vmatprep.subr.bf16.mxu0 %v1564_v3  ;;  %1400 = vmatprep.subr.bf16.mxu1 %v1564_v3  ;;  %v1569_v8 = vld [vmem:[%s1834_s17 + $0x18] sm:$0xff]   ;;  %v1571_v10 = vld [vmem:[%s1834_s17 + $0x20] sm:$0xff]   ;;  %v1573_v16 = vld [vmem:[%s1834_s17 + $0x28] sm:$0xff]   ;;  %vm1211_vm6 = vcmask (!%p1350_p7), 1024  }
  0x41   : > { %v1332_v12 = vld.sshfl [vmem:[%s1844_s28] sm:$0x33 pattern:$0x76325410]  ;;  %v1574_v18 = vld [vmem:[%s1834_s17 + $0x70] sm:$0xff]   ;;  %v1580_v41 = vld [vmem:[%s2003_s5 + $0x8] sm:$0xff] (!%p1350_p7)  }
  0x42   : > { %v434_v13 = vcombine.high %v1332_v12, %v1332_v12  ;;  %v1349_v14 = vld.sshfl [vmem:[%s1849_s22] sm:$0x33 pattern:$0x76325410]  ;;  %v1575_v20 = vld [vmem:[%s1834_s17 + $0x30] sm:$0xff]   ;;  %v437_v23 = vpack.c.bf16 %v1332_v12, %v1332_v12  ;;  %v1584_v45 = vld [vmem:[%s2003_s5 + $0x28] sm:$0xff] (!%p1350_p7)  }
  0x43   : > { %1379 = vmatpush3.bf16.msra.mxu0 %v1565_v4  ;;  %1401 = vmatpush3.bf16.msra.mxu1 %v1565_v4  ;;  %v587_v15 = vcombine.high %v1349_v14, %v1349_v14  ;;  %v1576_v21 = vld [vmem:[%s1834_s17 + $0x78] sm:$0xff]   ;;  %v590_v24 = vpack.c.bf16 %v1349_v14, %v1349_v14  ;;  %v1581_v42 = vld [vmem:[%s2003_s5 + $0x10] sm:$0xff] (!%p1350_p7)  }
  0x44   : > { %1380 = vmatprep.subr.bf16.mxu0 %v1566_v5  ;;  %1402 = vmatprep.subr.bf16.mxu1 %v1566_v5  ;;  %v438_v17 = vpack.c.bf16 %v434_v13, %v434_v13  ;;  %v1577_v22 = vld [vmem:[%s1834_s17 + $0x38] sm:$0xff]   ;;  %v1585_v51 = vld [vmem:[%s2003_s5 + $0x30] sm:$0xff] (!%p1350_p7)  }
  0x45   : > { %v591_v19 = vpack.c.bf16 %v587_v15, %v587_v15  ;;  %v424_v27 = vld [vmem:[#allocation2] sm:$0x3]  ;;  %v577_v29 = vld [vmem:[#allocation3] sm:$0x3]  ;;  %v1582_v43 = vld [vmem:[%s2003_s5 + $0x18] sm:$0xff] (!%p1350_p7)  }
  0x46   : > { %567 = vmatprep.mubr.bf16.mxu0 %v438_v17  ;;  %v1579_v39 = vld [vmem:[%s2003_s5] sm:$0xff] (!%p1350_p7)   ;;  %v1586_v54 = vld [vmem:[%s2003_s5 + $0x38] sm:$0xff] (!%p1350_p7)   ;;  %v1112_v17 = vlaneseq (!%p1350_p7) }
  0x47   : > { %1381 = vmatpush3.bf16.msra.mxu0 %v1567_v6  ;;  %1403 = vmatpush3.bf16.msra.mxu1 %v1567_v6  ;;  %v1583_v44 = vld [vmem:[%s2003_s5 + $0x20] sm:$0xff] (!%p1350_p7)  }
  0x48   : > { %1382 = vmatprep.subr.bf16.mxu0 %v1568_v7  ;;  %1404 = vmatprep.subr.bf16.mxu1 %v1568_v7  ;;  %v1351_v46 = vld [vmem:[%s2002_s4] ss:$0 sm:$0xff] (!%p1350_p7) }
  0x49   : > { %624 = vmatprep.mubr.bf16.mxu1 %v591_v19  ;;  %v1352_v57 = vld [vmem:[%s2004_s6] ss:$0 sm:$0xff] (!%p1350_p7)  ;;  %v1113_v19 = vshrl.u32 (!%p1350_p7), %v1112_v17, 7 }
  0x4b   : > { %1383 = vmatpush3.bf16.msra.mxu0 %v1569_v8  ;;  %1405 = vmatpush3.bf16.msra.mxu1 %v1569_v8 }
  0x4c   : > { %1384 = vmatprep.subr.bf16.mxu0 %v1570_v9  ;;  %1406 = vmatprep.subr.bf16.mxu1 %v1570_v9 }
  0x4f   : > { %1385 = vmatpush3.bf16.msra.mxu0 %v1571_v10  ;;  %1407 = vmatpush3.bf16.msra.mxu1 %v1571_v10 }
  0x50   : > { %1386 = vmatprep.subr.bf16.mxu0 %v1572_v11  ;;  %1408 = vmatprep.subr.bf16.mxu1 %v1572_v11 }
  0x53   : > { %1387 = vmatpush3.bf16.msra.mxu0 %v1573_v16  ;;  %1409 = vmatpush3.bf16.msra.mxu1 %v1573_v16  ;;  %v1693_v16 = vmov (!%p1350_p7), 0  }
  0x54   : > { %1388 = vmatprep.subr.bf16.mxu0 %v1574_v18  ;;  %1410 = vmatprep.subr.bf16.mxu1 %v1574_v18  ;;  %v894_v18 = vstv (!%p1350_p7), %s656_s26 }
  0x55   : > { %1578 = vset.pattern.permute.xlu0 (!%p1350_p7), %v1693_v16 }
  0x57   : > { %1389 = vmatpush3.bf16.msra.mxu0 %v1575_v20  ;;  %1411 = vmatpush3.bf16.msra.mxu1 %v1575_v20  ;;  %v1115_v20 = vand.u32 (!%p1350_p7), 127, %v1112_v17 }
  0x58   : > { %1390 = vmatprep.subr.bf16.mxu0 %v1576_v21  ;;  %1412 = vmatprep.subr.bf16.mxu1 %v1576_v21 }
  0x59   : > { %vm1116_vm4 = vcmp.eq.s32.totalorder (!%p1350_p7), %v1113_v19, %v1115_v20 }
  0x5b   : > { %1391 = vmatpush3.bf16.msra.mxu0 %v1577_v22  ;;  %1413 = vmatpush3.bf16.msra.mxu1 %v1577_v22 }
  0x5c   : > { %1466 = vmatprep.subr.bf16.mxu1 (!%p1350_p7), %v1691_v40  ;;  %1446 = vmatprep.subr.bf16.mxu0 (!%p1350_p7), %v1691_v40 }
  0x5e   : > { %568 = vmatmul.mubr.bf16.vlgmr.msra.gmra.mrb[0].mxu0 %v437_v23  ;;  %625 = vmatmul.mubr.bf16.vlgmr.msra.gmra.mrb[0].mxu1 %v590_v24 }
  0x5f   : > { %1467 = vmatpush3.bf16.msra.mxu1 (!%p1350_p7), %v1579_v39  ;;  %1447 = vmatpush3.bf16.msra.mxu0 (!%p1350_p7), %v1579_v39  ;;  %v1117_v39 = vld [vmem:[%s2005_s7] sm:$0x3] (!%p1350_p7) }
  0x60   : > { %1468 = vmatprep.subr.bf16.mxu1 (!%p1350_p7), %v1691_v40  ;;  %1448 = vmatprep.subr.bf16.mxu0 (!%p1350_p7), %v1691_v40 }
  0x61   : > { %1482 = vmatprep.mubr.msk.bf16.mxu1 (!%p1350_p7), %vm1692_vm0, %v1691_v40  ;;  %1462 = vmatprep.mubr.msk.bf16.mxu0 (!%p1350_p7), %vm1692_vm0, %v1691_v40 }
  0x63   : > { %1469 = vmatpush3.bf16.msra.mxu1 (!%p1350_p7), %v1580_v41  ;;  %1449 = vmatpush3.bf16.msra.mxu0 (!%p1350_p7), %v1580_v41 }
  0x64   : > { %1470 = vmatprep.subr.bf16.mxu1 (!%p1350_p7), %v1691_v40  ;;  %1450 = vmatprep.subr.bf16.mxu0 (!%p1350_p7), %v1691_v40 }
  0x67   : > { %1471 = vmatpush3.bf16.msra.mxu1 (!%p1350_p7), %v1581_v42  ;;  %1451 = vmatpush3.bf16.msra.mxu0 (!%p1350_p7), %v1581_v42 }
  0x68   : > { %1472 = vmatprep.subr.bf16.mxu1 (!%p1350_p7), %v1691_v40  ;;  %1452 = vmatprep.subr.bf16.mxu0 (!%p1350_p7), %v1691_v40 }
  0x6b   : > { %1473 = vmatpush3.bf16.msra.mxu1 (!%p1350_p7), %v1582_v43  ;;  %1453 = vmatpush3.bf16.msra.mxu0 (!%p1350_p7), %v1582_v43 }
  0x6c   : > { %1474 = vmatprep.subr.bf16.mxu1 (!%p1350_p7), %v1691_v40  ;;  %1454 = vmatprep.subr.bf16.mxu0 (!%p1350_p7), %v1691_v40 }
  0x6f   : > { %1475 = vmatpush3.bf16.msra.mxu1 (!%p1350_p7), %v1583_v44  ;;  %1455 = vmatpush3.bf16.msra.mxu0 (!%p1350_p7), %v1583_v44 }
  0x70   : > { %1476 = vmatprep.subr.bf16.mxu1 (!%p1350_p7), %v1691_v40  ;;  %1456 = vmatprep.subr.bf16.mxu0 (!%p1350_p7), %v1691_v40 }
  0x73   : > { %1477 = vmatpush3.bf16.msra.mxu1 (!%p1350_p7), %v1584_v45  ;;  %1457 = vmatpush3.bf16.msra.mxu0 (!%p1350_p7), %v1584_v45 }
  0x74   : > { %1478 = vmatprep.subr.bf16.mxu1 (!%p1350_p7), %v1691_v40  ;;  %1458 = vmatprep.subr.bf16.mxu0 (!%p1350_p7), %v1691_v40 }
  0x77   : > { %1479 = vmatpush3.bf16.msra.mxu1 (!%p1350_p7), %v1585_v51  ;;  %1459 = vmatpush3.bf16.msra.mxu0 (!%p1350_p7), %v1585_v51 }
  0x78   : > { %1480 = vmatprep.subr.bf16.mxu1 (!%p1350_p7), %v1691_v40  ;;  %1460 = vmatprep.subr.bf16.mxu0 (!%p1350_p7), %v1691_v40 }
  0x7b   : > { %1481 = vmatpush3.bf16.msra.mxu1 (!%p1350_p7), %v1586_v54  ;;  %1461 = vmatpush3.bf16.msra.mxu0 (!%p1350_p7), %v1586_v54 }
  0x7c   : > { %1491 = vmatprep.subr.mxu1 (!%p1350_p7), %v1691_v40  ;;  %1486 = vmatprep.subr.mxu0 (!%p1350_p7), %v1691_v40 }
 0x131   : > { %v1392_v25 = vpop.f32.mrb[0].mxu0  ;;  %v1414_v26 = vpop.f32.mrb[0].mxu1  ;;  %637 = sbr.rel (%p1350_p7) target bundleno = 1474 (0x5c2), region = 68 }
 0x132   : > { %v1393_v28 = vpop.f32.mrb[1].mxu0  ;;  %v1415_v30 = vpop.f32.mrb[1].mxu1 }
 0x133   : > { %v1394_v31 = vadd.f32 %v1393_v28, %v1392_v25  ;;  %v1416_v32 = vadd.f32 %v1415_v30, %v1414_v26  ;;  %v1395_v33 = vpop.f32.mrb[2].mxu0  ;;  %v1417_v34 = vpop.f32.mrb[2].mxu1 }
 0x134   : > { %v1396_v35 = vpop.f32.mrb[3].mxu0  ;;  %v1418_v36 = vpop.f32.mrb[3].mxu1 }
 0x135   : > { %v575_v37 = vadd.f32 %v1394_v31, %v424_v27  ;;  %v632_v38 = vadd.f32 %v1416_v32, %v577_v29 }
 0x137   : > { %576 = vst [vmem:[#allocation2] sm:$0x3] %v575_v37  ;;  %633 = vst [vmem:[#allocation3] sm:$0x3] %v632_v38 }
 0x13e   : > { %v769_v47 = vld [vmem:[#allocation3] sm:$0x3]  ;;  %v657_v48 = vld [vmem:[#allocation2] sm:$0x3] }
 0x13f   : > { %v770_v49 = vadd.f32 %v1351_v46, %v769_v47  ;;  %v664_v50 = vadd.f32 %v1351_v46, %v657_v48 }
 0x141   : > { %v771_v52 = vmax.f32 %v770_v49, 0.0  ;;  %v665_v53 = vmax.f32 %v664_v50, 0.0 }
 0x143   : > { %v772_v55 = vpack.c.bf16 %v771_v52, %v771_v52  ;;  %v666_v56 = vpack.c.bf16 %v665_v53, %v665_v53  ;;  %v1369_v52 = vld [vmem:[%s2006_s8] ss:$0 sm:$0xff] }
 0x145   : > { %1483 = vmatmul.mubr.bf16.vlgmr.msra.gmra.mrb[0].mxu1 %v772_v55  ;;  %1463 = vmatmul.mubr.bf16.vlgmr.msra.gmra.mrb[0].mxu0 %v666_v56 }
 0x146   : > { %1493 = vmatprep.mubr.msk.f32.mxu1 %vm1692_vm0, %v1691_v40  ;;  %1488 = vmatprep.mubr.msk.f32.mxu0 %vm1692_vm0, %v1691_v40 }
 0x218   : > { %v807_v58 = vpop.f32.mrb[0].mxu1  ;;  %v755_v59 = vpop.f32.mrb[0].mxu0 }
 0x219   : > { %v808_v60 = vadd.f32 %v1352_v57, %v807_v58  ;;  %v756_v61 = vadd.f32 %v1352_v57, %v755_v59  ;;  %v1484_v62 = vpop.f32.mrb[1].mxu1  ;;  %v1464_v63 = vpop.f32.mrb[1].mxu0 }
 0x21a   : > { %v810_v0 = vpop.f32.mrb[2].mxu1  ;;  %v758_v1 = vpop.f32.mrb[2].mxu0 }
 0x21b   : > { %v1485_v2 = vpop.f32.mrb[3].mxu1  ;;  %v1465_v3 = vpop.f32.mrb[3].mxu0  ;;  %v813_v4 = vmul.f32 %v808_v60, %v808_v60  ;;  %v761_v5 = vmul.f32 %v756_v61, %v756_v61 }
 0x21d   : > { %v814_v6 = vsel %vm762_vm1, %v813_v4, 0.0  ;;  %v763_v7 = vsel %vm762_vm1, %v761_v5, 0.0 }
 0x21e   : > { %815 = vadd.xlane.f32.xlu0 %v814_v6 }
 0x222   : > { %764 = vadd.xlane.f32.xlu0 %v763_v7 }
 0x2ab   : > { %v816_v8 = vpop.xlane.xlu0 %815 }
 0x2ac   : > { %v817_v9 = vmax.f32 %v816_v8, 1e-24 }
 0x2ae   : > { %1587 = vrsqrt.f32 %v817_v9 }
 0x2af   : > { %v765_v10 = vpop.xlane.xlu0 %764 }
 0x2b0   : > { %v766_v11 = vmax.f32 %v765_v10, 1e-24 }
 0x2b2   : > { %1589 = vrsqrt.f32 %v766_v11 }
 0x2b8   : > { %v1588_v12 = vpop.eup %1587 }
 0x2b9   : > { %v819_v13 = vmul.f32 %v1588_v12, %v808_v60 }
 0x2bb   : > { %1492 = vmatpush3.xpose.msk.msra.mxu1 %vm820_vm2, %v819_v13 }
 0x2bc   : > { %v1590_v14 = vpop.eup %1589  ;;  %1501 = vmatprep.subr.mxu1 %v1691_v40 }
 0x2bd   : > { %v768_v15 = vmul.f32 %v1590_v14, %v756_v61 }
 0x2bf   : > { %1487 = vmatpush3.xpose.msk.msra.mxu0 %vm820_vm2, %v768_v15  ;;  %1494 = vmatmul.mubr.msk.f32.vlgmr.msra.gmra.mrb[4].mxu1 %vm820_vm2, %v768_v15 }
 0x2c0   : > { %1502 = vmatpush3.xpose.msk.msra.mxu1 %vm820_vm2, %v819_v13  ;;  %1496 = vmatprep.subr.mxu0 %v1691_v40 }
 0x2c1   : > { %1503 = vmatprep.mubr.msk.f32.mxu1 %vm1692_vm0, %v1691_v40 }
 0x2c2   : > { %1489 = vmatmul.mubr.msk.f32.vlgmr.msra.gmra.mrb[4].mxu0 %vm820_vm2, %v768_v15 }
 0x2c3   : > { %1497 = vmatpush3.xpose.msk.msra.mxu0 %vm820_vm2, %v768_v15  ;;  %1504 = vmatmul.mubr.msk.f32.vlgmr.msra.gmra.mrb[6].mxu1 %vm820_vm2, %v819_v13 }
 0x2c4   : > { %1498 = vmatprep.mubr.msk.f32.mxu0 %vm1692_vm0, %v1691_v40 }
 0x2c6   : > { %1499 = vmatmul.mubr.msk.f32.vlgmr.msra.gmra.mrb[6].mxu0 %vm820_vm2, %v819_v13 }
 0x392   : > { %v965_v21 = vpop.f32.mrb[4].mxu1 }
 0x393   : > { %v1933_v22 = vmul.f32 %v965_v21, %v894_v18  ;;  %v1495_v23 = vpop.f32.mrb[5].mxu1 }
 0x395   : > { %v890_v24 = vpop.f32.mrb[4].mxu0  ;;  %v1134_v25 = vsel %vm1130_vm3, %v1933_v22, -inf }
 0x396   : > { %v895_v26 = vmul.f32 %v894_v18, %v890_v24  ;;  %1135 = vmax.xlane.f32.xlu1 %v1134_v25  ;;  %v1490_v27 = vpop.f32.mrb[5].mxu0  ;;  %v1107_v28 = vpop.f32.mrb[6].mxu1 }
 0x397   : > { %v1111_v29 = vmul.f32 %v1107_v28, %v894_v18  ;;  %v1505_v30 = vpop.f32.mrb[7].mxu1 }
 0x398   : > { %v1129_v31 = vsel %vm1116_vm4, -1e+30, %v895_v26 }
 0x399   : > { %v1036_v32 = vpop.f32.mrb[6].mxu0  ;;  %v1131_v33 = vsel %vm1130_vm3, %v1129_v31, -inf  ;;  %v1175_v34 = vsel %vm1116_vm4, -1e+30, %v1111_v29 }
 0x39a   : > { %v1040_v35 = vmul.f32 %v1036_v32, %v894_v18  ;;  %1132 = vmax.xlane.f32.xlu1 %v1131_v33  ;;  %v1500_v36 = vpop.f32.mrb[7].mxu0  ;;  %v1176_v37 = vsel %vm1130_vm3, %v1175_v34, -inf }
 0x39b   : > { %1177 = vmax.xlane.f32.xlu0 %v1176_v37 }
 0x39c   : > { %v1179_v38 = vsel %vm1130_vm3, %v1040_v35, -inf }
 0x39e   : > { %1180 = vmax.xlane.f32.xlu1 %v1179_v38 }
 0x3b1   : > { %1120 = vperm.xlu0 %1578, %v1117_v39  }
 0x423   : > { %v1136_v41 = vpop.xlane.xlu1 %1135 }
 0x427   : > { %v1133_v42 = vpop.xlane.xlu1 %1132 }
 0x428   : > { %v1945_v43 = vmax.f32 %v1133_v42, %v1136_v41  ;;  %v1178_v46 = vpop.xlane.xlu0 %1177 }
 0x42a   : > { %v1138_v44 = vsub.f32 %v1129_v31, %v1945_v43  ;;  %v1144_v45 = vsub.f32 %v1933_v22, %v1945_v43 }
 0x42b   : > { %v1181_v47 = vpop.xlane.xlu1 %1180 }
 0x42c   : > { %v1139_v48 = vmul.f32 1.442695, %v1138_v44  ;;  %v1145_v49 = vmul.f32 1.442695, %v1144_v45  ;;  %v1950_v50 = vmax.f32 %v1178_v46, %v1181_v47 }
 0x42e   : > { %1591 = vpow2.f32 %v1139_v48  ;;  %v1183_v51 = vsub.f32 %v1175_v34, %v1950_v50  ;;  %v1189_v54 = vsub.f32 %v1040_v35, %v1950_v50 }
 0x42f   : > { %1593 = vpow2.f32 %v1145_v49 }
 0x430   : > { %v1184_v53 = vmul.f32 1.442695, %v1183_v51  ;;  %v1121_v55 = vpop.permute.xlu0 %1120  ;;  %v1190_v58 = vmul.f32 1.442695, %v1189_v54 }
 0x431   : > { %vm1126_vm5 = vcmp.eq.s32.totalorder %v1121_v55, %v1369_v52 }
 0x432   : > { %v1370_v56 = vsel %vm1126_vm5, 1.0, %v1691_v40  ;;  %1595 = vpow2.f32 %v1184_v53 }
 0x433   : > { %v1154_v57 = vsel %vm1116_vm4, 0.0, %v1370_v56  ;;  %1597 = vpow2.f32 %v1190_v58  ;;  %v1158_v3 = vsel %vm1130_vm3, %v1370_v56, 0.0  ;;  %v1166_v6 = vmul.f32 %v1370_v56, %v1933_v22 }
 0x434   : > { %v1155_v59 = vsel %vm1130_vm3, %v1154_v57, 0.0  ;;  %v1162_v4 = vmul.f32 %v1154_v57, %v895_v26  ;;  %v1199_v8 = vmul.f32 %v1154_v57, %v1111_v29  ;;  %v1203_v10 = vmul.f32 %v1370_v56, %v1040_v35 }
 0x435   : > { %1156 = vadd.xlane.f32.xlu1 %v1155_v59  ;;  %v1167_v7 = vsel %vm1130_vm3, %v1166_v6, 0.0 }
 0x436   : > { %v1163_v5 = vsel %vm1130_vm3, %v1162_v4, 0.0  ;;  %v1200_v9 = vsel %vm1130_vm3, %v1199_v8, 0.0  ;;  %v1204_v11 = vsel %vm1130_vm3, %v1203_v10, 0.0 }
 0x438   : > { %v1592_v60 = vpop.eup %1591 }
 0x439   : > { %v1141_v61 = vsel %vm1130_vm3, %v1592_v60, 0.0  ;;  %v1594_v62 = vpop.eup %1593 }
 0x43a   : > { %1142 = vadd.xlane.f32.xlu1 %v1141_v61  ;;  %v1147_v63 = vsel %vm1130_vm3, %v1594_v62, 0.0 }
 0x43c   : > { %v1596_v0 = vpop.eup %1595 }
 0x43d   : > { %v1186_v1 = vsel %vm1130_vm3, %v1596_v0, 0.0  ;;  %v1598_v40 = vpop.eup %1597 }
 0x43e   : > { %1148 = vadd.xlane.f32.xlu1 %v1147_v63  ;;  %v1192_v2 = vsel %vm1130_vm3, %v1598_v40, 0.0 }
 0x442   : > { %1187 = vadd.xlane.f32.xlu1 %v1186_v1 }
 0x446   : > { %1193 = vadd.xlane.f32.xlu1 %v1192_v2 }
 0x44a   : > { %1159 = vadd.xlane.f32.xlu1 %v1158_v3 }
 0x44e   : > { %1164 = vadd.xlane.f32.xlu1 %v1163_v5 }
 0x452   : > { %1168 = vadd.xlane.f32.xlu1 %v1167_v7 }
 0x456   : > { %1201 = vadd.xlane.f32.xlu1 %v1200_v9 }
 0x45a   : > { %1205 = vadd.xlane.f32.xlu1 %v1204_v11 }
 0x4c2   : > { %v1157_v12 = vpop.xlane.xlu1 %1156 }
 0x4c7   : > { %v1143_v13 = vpop.xlane.xlu1 %1142 }
 0x4cb   : > { %v1149_v14 = vpop.xlane.xlu1 %1148 }
 0x4cc   : > { %v1150_v15 = vadd.f32 %v1149_v14, %v1143_v13 }
 0x4ce   : > { %1599 = vlog2.f32 %v1150_v15 }
 0x4cf   : > { %v1188_v16 = vpop.xlane.xlu1 %1187 }
 0x4d3   : > { %v1194_v17 = vpop.xlane.xlu1 %1193 }
 0x4d4   : > { %v1195_v18 = vadd.f32 %v1194_v17, %v1188_v16 }
 0x4d6   : > { %1601 = vlog2.f32 %v1195_v18 }
 0x4d7   : > { %v1160_v19 = vpop.xlane.xlu1 %1159 }
 0x4d8   : > { %v1600_v20 = vpop.eup %1599  ;;  %v1161_v21 = vadd.f32 %v1160_v19, %v1157_v12 }
 0x4d9   : > { %v1152_v22 = vmul.f32 0.6931472, %v1600_v20 }
 0x4da   : > { %1603 = vrcp.f32 %v1161_v21 }
 0x4db   : > { %v1165_v23 = vpop.xlane.xlu1 %1164  ;;  %v1153_v24 = vadd.f32 %v1152_v22, %v1945_v43 }
 0x4dd   : > { %v1171_v27 = vmul.f32 %v1161_v21, %v1153_v24 }
 0x4df   : > { %v1169_v25 = vpop.xlane.xlu1 %1168 }
 0x4e0   : > { %v1602_v26 = vpop.eup %1601  ;;  %v1170_v28 = vadd.f32 %v1169_v25, %v1165_v23 }
 0x4e1   : > { %v1197_v29 = vmul.f32 0.6931472, %v1602_v26 }
 0x4e2   : > { %v1172_v30 = vsub.f32 %v1170_v28, %v1171_v27 }
 0x4e3   : > { %v1202_v31 = vpop.xlane.xlu1 %1201  ;;  %v1198_v33 = vadd.f32 %v1197_v29, %v1950_v50 }
 0x4e4   : > { %v1604_v32 = vpop.eup %1603 }
 0x4e5   : > { %v1174_v34 = vmul.f32 %v1604_v32, %v1172_v30  ;;  %v1208_v37 = vmul.f32 %v1198_v33, %v1161_v21 }
 0x4e7   : > { %v1206_v35 = vpop.xlane.xlu1 %1205  ;;  %v1212_v36 = vsel %vm1211_vm6, %v1174_v34, 0.0 }
 0x4e8   : > { %v1207_v38 = vadd.f32 %v1206_v35, %v1202_v31  ;;  %1213 = vadd.xlane.f32.xlu1 %v1212_v36 }
 0x4ea   : > { %v1209_v39 = vsub.f32 %v1207_v38, %v1208_v37 }
 0x4ec   : > { %v1210_v41 = vmul.f32 %v1604_v32, %v1209_v39 }
 0x4ee   : > { %v1222_v42 = vsel %vm1211_vm6, %v1210_v41, 0.0 }
 0x4ef   : > { %1223 = vadd.xlane.f32.xlu0 %v1222_v42 }
 0x575   : > { %v1214_v43 = vpop.xlane.xlu1 %1213 }
 0x576   : > { %v1215_v44 = vrot.slane %v1214_v43, 4 }
 0x578   : > { %v1216_v45 = vadd.f32 %v1215_v44, %v1214_v43 }
 0x57a   : > { %v1217_v46 = vrot.slane %v1216_v45, 2 }
 0x57c   : > { %v1224_v47 = vpop.xlane.xlu0 %1223  ;;  %v1218_v48 = vadd.f32 %v1217_v46, %v1216_v45 }
 0x57d   : > { %v1225_v49 = vrot.slane %v1224_v47, 4 }
 0x57e   : > { %v1219_v51 = vrot.slane %v1218_v48, 1 }
 0x57f   : > { %v1226_v50 = vadd.f32 %v1225_v49, %v1224_v47 }
 0x580   : > { %v1220_v52 = vadd.f32 %v1219_v51, %v1218_v48 }
 0x581   : > { %v1227_v53 = vrot.slane %v1226_v50, 2 }
 0x582   : > { %1506 = vpush %v1220_v52 }
 0x583   : > { %v1228_v54 = vadd.f32 %v1227_v53, %v1226_v50 }
 0x585   : > { %v1229_v55 = vrot.slane %v1228_v54, 1 }
 0x587   : > { %v1230_v56 = vadd.f32 %v1229_v55, %v1228_v54 }
 0x589   : > { %1508 = vpush %v1230_v56 }
 0x5b3   : > { %s1507_s17 = spop %1506 }
 0x5ba   : > { %s1509_s21 = spop %1508 }
 0x5bb   : > { %s1232_s25 = sadd.f32 %s1509_s21, %s1507_s17 }
 0x5bd   : > { %s1233_s14 = ssub.f32 0.0, %s1232_s25 }
 0x5bf   : > { %s1236_s27 = smul.f32 0.25, %s1233_s14 }
 0x5c1   : > { %1238 = sst [smem:[#allocation8]] %s1236_s27 }
 0x5c2 PF: > { %p1521_p4 = scmp.eq.s32.totalorder %s1767_s0, 3  ;;  %s1635_s20 = scalar_lea.hbm %s2007_s9, 16 }
 0x5c3   : > { %p1636_p5 = scmp.ne.s32.totalorder %s2007_s9, %s1635_s20  ;;  %p1641_p12 = scmp.lt.u32.totalorder %s1635_s20, %s2007_s9 }
 0x5c5   : > { %p1637_p6 = pnand %p1636_p5, %p1521_p4 }
 0x5c7   : > { %p1638_p10 = pneg %p1637_p6 }
 0x5c9   : > { %p1643_p0 = pnand %p1641_p12, %p1638_p10 }
 0x5cb   : > { %1646 = shalt.err (!%p1643_p0)
}
 0x5cc   : > { %s1694_s26 = smov [#allocation8]  }
 0x5cd   : > { %1513 = dma.smem_to_hbm (%p1521_p4), %s1694_s26, 16, %s2007_s9, [#allocation7]  }
 0x5ce   : > { %1668 = dma.done.wait (%p1521_p4), [#allocation7], 16  }
 0x5cf   : > { %1670 = vsyncadd (%p1521_p4), [#allocation7], 4294967280 }
 0x5d0   : > { %1252 = sfence }
 0x5d1 PF: > { %p21_p1 = scmp.ge.s32.totalorder %s1770_s15, 6   ;;  %s2011_s11 = smov %s1677_s12 }
 0x5d2   : > { %s2012_s12 = smov %s1681_s13  ;;  %s2013_s13 = smov %s1780_s18 }
 0x5d3   : > { %s2014_s14 = smov %s1770_s15  ;;  %23 = sbr.rel (!%p21_p1) target bundleno = 6 (0x6), region = 108 }
 0x5da   :  { %1258 = vsyncpa [#allocation6], 1 }
 0x5db   :  { %1260 = vsyncpa [#allocation6 + $0x1], 1 }
 0x5dc   :  { %1261 = vsyncpa [#allocation7], 1 }
 0x5dd   :  { %1263 = vsyncpa [#allocation7 + $0x1], 1 }

</bundles_post_ra>
